<compile_context>
chip_gen: v6e
topology: v6e:2x2x1
jax: 0.10.0
libtpu: 0.0.40
codegen_flags: <defaults>
</compile_context>

<pallas_src>
import functools

import jax
import jax.numpy as jnp
from jax import lax
from jax.experimental import pallas as pl
from jax.experimental.pallas import tpu as pltpu


def _round_up(x, m):
    return ((x + m - 1) // m) * m


def _round_down(x, m):
    return (x // m) * m


# ----------------------------------------------------------------------------
# Pallas kernel: value head  y = logits @ W^T + b  over one vocab tile.
# Grid = (KT,)  — vocab reduction ("arbitrary").
#
#   bias_ref: (1,)         f32  SMEM (scalar prefetch)
#   x_ref:    (B, tc, 128) bf16 VMEM (lane/sublane-dense logits tile)
#   w_ref:    (tc, 128)    bf16 VMEM (matching tile of the Linear weight row)
#   o_ref:    (B, 1)       bf16 VMEM (final value, written on the last step)
#   acc_ref:  (B, 128)     f32  VMEM (small lane-wise running sum)
# ----------------------------------------------------------------------------
def _value_head_kernel(bias_ref, x_ref, w_ref, o_ref, acc_ref, *,
                       rows_total, ragged):
    k = pl.program_id(0)
    nk = pl.num_programs(0)

    @pl.when(k == 0)
    def _():
        acc_ref[...] = jnp.zeros_like(acc_ref)

    # f32 products on the VPU, reduced over the sublane (vocab-row) axis inside
    # the step so the carried accumulator stays tiny ([B, 128] f32).
    x = x_ref[...].astype(jnp.float32)             # [B, tc, 128]
    w = w_ref[...].astype(jnp.float32)             # [tc, 128]
    prod = x * w[None, :, :]                       # [B, tc, 128]

    if ragged:
        # Last tile sticks out past the real vocab: zero the out-of-range rows
        # (their VMEM contents are unspecified — do not rely on them).
        tc = w_ref.shape[0]
        rows_valid = rows_total - k * tc
        row_ids = lax.broadcasted_iota(jnp.int32, (tc, 128), 0)
        prod = jnp.where((row_ids < rows_valid)[None, :, :], prod, 0.0)

    acc_ref[...] += jnp.sum(prod, axis=1)          # [B, 128]

    @pl.when(k == nk - 1)
    def _():
        # Single cross-lane reduce + bias + bf16 cast, only once at the end.
        val = jnp.sum(acc_ref[...], axis=1, keepdims=True) + bias_ref[0]
        o_ref[...] = val.astype(o_ref.dtype)


def value_head(logits_bf16, w_bf16, b_bf16, *,
               max_block_rows=None,
               x_vmem_budget_bytes=24 * 1024 * 1024):
    """Value head y = (x @ W^T + b).squeeze(1)   (nn.Linear(vocab_size, 1, bf16)).

    logits_bf16: [B, V] bf16
    w_bf16:      [1, V] bf16   (PyTorch Linear.weight)
    b_bf16:      [1]    bf16   (PyTorch Linear.bias)
    returns:     [B]    bf16
    """
    B, V = logits_bf16.shape

    # Degenerate fallback only (V not lane-aligned); hot path is copy-free.
    if V % 128 != 0:
        V_pad = _round_up(V, 128)
        logits_bf16 = jnp.pad(logits_bf16, ((0, 0), (0, V_pad - V)))
        w_bf16 = jnp.pad(w_bf16, ((0, 0), (0, V_pad - V)))
        V = V_pad

    R = V // 128                                   # 128-lane rows of the vocab

    # Free row-major reshapes to lane/sublane-dense tiles (no data movement).
    x = logits_bf16.reshape(B, R, 128)
    w = w_bf16.reshape(R, 128)
    bias = b_bf16.astype(jnp.float32).reshape(1)

    # Tile rows: the biggest block that fits the double-buffered VMEM budget.
    # For realistic B the entire vocab fits in one grid step.
    rows_budget = max(16, x_vmem_budget_bytes // (2 * B * 128 * 2))
    if max_block_rows is not None:
        rows_budget = min(rows_budget, max_block_rows)

    if rows_budget >= R:
        tc, kt, ragged = R, 1, False               # single step, no masking
    else:
        tc = max(16, _round_down(rows_budget, 16)) # bf16 (16,128) sublane-dense
        kt = pl.cdiv(R, tc)
        ragged = (R % tc) != 0

    kernel = functools.partial(_value_head_kernel, rows_total=R, ragged=ragged)

    out = pl.pallas_call(
        kernel,
        out_shape=jax.ShapeDtypeStruct((B, 1), jnp.bfloat16),
        grid_spec=pltpu.PrefetchScalarGridSpec(
            num_scalar_prefetch=1,                 # bias -> SMEM scalar
            grid=(kt,),
            in_specs=[
                pl.BlockSpec((B, tc, 128), lambda k, b: (0, k, 0)),
                pl.BlockSpec((tc, 128), lambda k, b: (k, 0)),
            ],
            out_specs=pl.BlockSpec((B, 1), lambda k, b: (0, 0)),
            scratch_shapes=[pltpu.VMEM((B, 128), jnp.float32)],
        ),
        compiler_params=pltpu.CompilerParams(
            dimension_semantics=("arbitrary",),
            vmem_limit_bytes=48 * 1024 * 1024,     # stays inside v7x's 64 MiB VMEM
        ),
    )(bias, x, w)

    return out[:, 0]                               # squeeze(dim=1) -> [B] bf16


# ----------------------------------------------------------------------------
# Synthetic stand-in for base_model(...).logits[:, -1]  (plain-JAX glue).
# TODO(synk): the real ChatGLM3-6B transformer backbone is an external
# pretrained model and is not re-implemented as a Pallas kernel here.
# ----------------------------------------------------------------------------
def synthetic_base_last_logits(input_ids, attention_mask, embed, lm_head):
    del attention_mask                             # shape parity only
    last_tok = input_ids[:, -1]                    # [B]
    h = embed[last_tok]                            # [B, H] bf16
    logits = jnp.dot(h.astype(jnp.float32),
                     lm_head.astype(jnp.float32))  # [B, V] f32
    return logits.astype(jnp.bfloat16)             # logits[:, -1] in bf16


if __name__ == "__main__":
    # Small synthetic shapes consistent with the forward pass.
    # V = 37 * 128 is lane-aligned (like the real ChatGLM vocab 65024 = 508*128)
    # but not a multiple of the tile size, so the forced multi-step run below
    # exercises the in-kernel ragged-tail masking.
    B, S, H, V = 2, 8, 32, 4736

    key = jax.random.PRNGKey(0)
    k_ids, k_emb, k_lm, k_w, k_b = jax.random.split(key, 5)

    input_ids = jax.random.randint(k_ids, (B, S), 0, V, dtype=jnp.int32)
    attention_mask = jnp.ones((B, S), dtype=jnp.int32)

    # Deterministic synthetic "base model" parameters.
    embed = (jax.random.normal(k_emb, (V, H), jnp.float32) * 0.1).astype(jnp.bfloat16)
    lm_head = (jax.random.normal(k_lm, (H, V), jnp.float32) * 0.1).astype(jnp.bfloat16)

    # Value head (nn.Linear(vocab_size, 1, dtype=bf16)) parameters.
    ln_w = (jax.random.normal(k_w, (1, V), jnp.float32) * (1.0 / V) ** 0.5).astype(jnp.bfloat16)
    ln_b = (jax.random.normal(k_b, (1,), jnp.float32) * 0.1).astype(jnp.bfloat16)

    # Forward pass.
    logits_last = synthetic_base_last_logits(input_ids, attention_mask, embed, lm_head)

    # Reference (plain JAX, f32 accumulation), as the bf16 Linear would produce.
    ref = (jnp.dot(logits_last.astype(jnp.float32), ln_w[0].astype(jnp.float32))
           + ln_b.astype(jnp.float32)[0]).astype(jnp.bfloat16)

    # 1) Default path: whole vocab in a single grid step (no masking).
    value = jax.block_until_ready(value_head(logits_last, ln_w, ln_b))    # [B] bf16
    assert value.shape == (B,)
    assert value.dtype == jnp.bfloat16
    assert jnp.allclose(value.astype(jnp.float32), ref.astype(jnp.float32),
                        rtol=2e-2, atol=2e-2)

    # 2) Forced multi-step path: exercises cross-step accumulation and the
    #    ragged last-tile mask (37 rows split into 16+16+5).
    value2 = jax.block_until_ready(
        value_head(logits_last, ln_w, ln_b, max_block_rows=16))
    assert value2.shape == (B,)
    assert jnp.allclose(value2.astype(jnp.float32), ref.astype(jnp.float32),
                        rtol=2e-2, atol=2e-2)

    print("KERNEL_OK")
</pallas_src>

<mosaic_0001>
module attributes {stable_mosaic.version = 11 : i64} {
  func.func @_value_head_kernel(%arg0: i32, %arg1: memref<1xf32, #tpu.memory_space<smem>>, %arg2: memref<2x37x128xbf16, #tpu.memory_space<vmem>>, %arg3: memref<37x128xbf16, #tpu.memory_space<vmem>>, %arg4: memref<2x1xbf16, #tpu.memory_space<vmem>>, %arg5: memref<2x128xf32, #tpu.memory_space<vmem>>) attributes {dimension_semantics = [#tpu.dimension_semantics<arbitrary>], iteration_bounds = array<i64: 1>, scalar_prefetch = 1 : i64, scratch_operands = 1 : i64, tpu.core_type = #tpu.core_type<tc>, window_params = [{transform_indices = @transform_0, window_bounds = array<i64: 2, 37, 128>}, {transform_indices = @transform_1, window_bounds = array<i64: 37, 128>}, {pipeline_mode = #tpu.pipeline_mode<synchronous>, transform_indices = @transform_2, window_bounds = array<i64: 2, 1>}]} {
    %c0_i32 = arith.constant 0 : i32
    %0 = arith.cmpi eq, %arg0, %c0_i32 : i32
    %1 = arith.extui %0 : i1 to i32
    %c0_i32_0 = arith.constant 0 : i32
    %2 = arith.cmpi ne, %1, %c0_i32_0 : i32
    scf.if %2 {
      %cst_11 = arith.constant 0.000000e+00 : f32
      %17 = vector.broadcast %cst_11 : f32 to vector<2x128xf32>
      %c0_12 = arith.constant 0 : index
      %c0_13 = arith.constant 0 : index
      %18 = vector.load %arg5[%c0_12, %c0_13] : memref<2x128xf32, #tpu.memory_space<vmem>>, vector<2x128xf32>
      tpu.vector_store %arg5[%c0_12, %c0_13], %17 {strides = array<i32>} : memref<2x128xf32, #tpu.memory_space<vmem>>, vector<2x128xf32>,
    } else {
    }
    %c0 = arith.constant 0 : index
    %c0_1 = arith.constant 0 : index
    %c0_2 = arith.constant 0 : index
    %3 = vector.load %arg2[%c0, %c0_1, %c0_2] : memref<2x37x128xbf16, #tpu.memory_space<vmem>>, vector<2x37x128xbf16>
    %4 = arith.extf %3 : vector<2x37x128xbf16> to vector<2x37x128xf32>
    %c0_3 = arith.constant 0 : index
    %c0_4 = arith.constant 0 : index
    %5 = vector.load %arg3[%c0_3, %c0_4] : memref<37x128xbf16, #tpu.memory_space<vmem>>, vector<37x128xbf16>
    %6 = arith.extf %5 : vector<37x128xbf16> to vector<37x128xf32>
    %7 = vector.shape_cast %6 : vector<37x128xf32> to vector<1x37x128xf32>
    %8 = vector.broadcast %7 : vector<1x37x128xf32> to vector<2x37x128xf32>
    %9 = arith.mulf %4, %8 : vector<2x37x128xf32>
    %c0_5 = arith.constant 0 : index
    %c0_6 = arith.constant 0 : index
    %10 = vector.load %arg5[%c0_5, %c0_6] : memref<2x128xf32, #tpu.memory_space<vmem>>, vector<2x128xf32>
    %cst = arith.constant dense<0.000000e+00> : vector<2x128xf32>
    %11 = vector.multi_reduction <add>, %9, %cst [1] : vector<2x37x128xf32> to vector<2x128xf32>
    %12 = arith.addf %10, %11 : vector<2x128xf32>
    %c0_7 = arith.constant 0 : index
    %c0_8 = arith.constant 0 : index
    %13 = vector.load %arg5[%c0_7, %c0_8] : memref<2x128xf32, #tpu.memory_space<vmem>>, vector<2x128xf32>
    tpu.vector_store %arg5[%c0_7, %c0_8], %12 {strides = array<i32>} : memref<2x128xf32, #tpu.memory_space<vmem>>, vector<2x128xf32>,
    %c0_i32_9 = arith.constant 0 : i32
    %14 = arith.cmpi eq, %arg0, %c0_i32_9 : i32
    %15 = arith.extui %14 : i1 to i32
    %c0_i32_10 = arith.constant 0 : i32
    %16 = arith.cmpi ne, %15, %c0_i32_10 : i32
    scf.if %16 {
      %c0_11 = arith.constant 0 : index
      %c0_12 = arith.constant 0 : index
      %17 = vector.load %arg5[%c0_11, %c0_12] : memref<2x128xf32, #tpu.memory_space<vmem>>, vector<2x128xf32>
      %cst_13 = arith.constant dense<0.000000e+00> : vector<2xf32>
      %18 = vector.multi_reduction <add>, %17, %cst_13 [1] : vector<2x128xf32> to vector<2xf32>
      %19 = vector.shape_cast %18 : vector<2xf32> to vector<2x1xf32>
      %c0_14 = arith.constant 0 : index
      %20 = memref.load %arg1[%c0_14] : memref<1xf32, #tpu.memory_space<smem>>
      %21 = vector.broadcast %20 : f32 to vector<2x1xf32>
      %22 = arith.addf %19, %21 : vector<2x1xf32>
      %23 = arith.truncf %22 : vector<2x1xf32> to vector<2x1xbf16>
      %c0_15 = arith.constant 0 : index
      %c0_16 = arith.constant 0 : index
      %24 = vector.load %arg4[%c0_15, %c0_16] : memref<2x1xbf16, #tpu.memory_space<vmem>>, vector<2x1xbf16>
      tpu.vector_store %arg4[%c0_15, %c0_16], %23 {strides = array<i32>} : memref<2x1xbf16, #tpu.memory_space<vmem>>, vector<2x1xbf16>,
    } else {
    }
    return
  }
  func.func @transform_0(%arg0: i32, %arg1: memref<1xf32, #tpu.memory_space<smem>>) -> (i32, i32, i32) {
    %c0_i32 = arith.constant 0 : i32
    %c0_i32_0 = arith.constant 0 : i32
    %c0_i32_1 = arith.constant 0 : i32
    return %c0_i32, %arg0, %c0_i32_0 : i32, i32, i32
  }
  func.func @transform_1(%arg0: i32, %arg1: memref<1xf32, #tpu.memory_space<smem>>) -> (i32, i32) {
    %c0_i32 = arith.constant 0 : i32
    %c0_i32_0 = arith.constant 0 : i32
    return %arg0, %c0_i32 : i32, i32
  }
  func.func @transform_2(%arg0: i32, %arg1: memref<1xf32, #tpu.memory_space<smem>>) -> (i32, i32) {
    %c0_i32 = arith.constant 0 : i32
    %c0_i32_0 = arith.constant 0 : i32
    %c0_i32_1 = arith.constant 0 : i32
    return %c0_i32, %c0_i32_0 : i32, i32
  }
}

</mosaic_0001>

<bundles_post_ra>
// kernel: tpu_custom_call.1
= control target key start
LH: loop header
LB: loop body
LE: loop exit
PB: predicated region body
PF: predicated region fallthrough
CT: control target
= control target key end

     0   :  { %v165_v3 = vmov 0.0   ;;  %s222_s0 = inlined_call_operand.<no memory space> [shape: f32[1], index: 0, kind: input, shape index: {}]   ;;  %s223_s1 = inlined_call_operand.vmem [shape: bf16[2,37,128], index: 1, kind: input, shape index: {}]   ;;  %s224_s2 = inlined_call_operand.vmem [shape: bf16[37,128], index: 2, kind: input, shape index: {}]   ;;  %s225_s3 = inlined_call_operand.hbm [shape: bf16[2,1], index: 3, kind: output, shape index: {}]  }
   0x1   :  { %v119_v0 = vld [vmem:[%s223_s1] sm:$0xff]   ;;  %v138_v1 = vld [vmem:[%s223_s1 + $0x8] sm:$0xff]   ;;  %v23_v2 = vld [vmem:[%s223_s1 + $0x10] sm:$0x7]  ;;  %18 = vst [vmem:[#allocation2] sm:$0x3] %v165_v3 }
   0x2   :  { %v120_v4 = vunpack.c.l.bf16 %v119_v0  ;;  %v121_v5 = vunpack.c.h.bf16 %v119_v0  ;;  %v124_v6 = vunpack.c.l.bf16 %v138_v1  ;;  %v125_v7 = vunpack.c.h.bf16 %v138_v1  ;;  %v24_v8 = vld [vmem:[%s223_s1 + $0x14] ss:$12 sps:$4 sm:$0xff]   ;;  %v139_v9 = vld [vmem:[%s223_s1 + $0x18] sm:$0xff]   ;;  %v28_v10 = vld [vmem:[%s223_s1 + $0x24] sm:$0x7] }
   0x3   :  { %v128_v11 = vunpack.c.l.bf16 %v139_v9  ;;  %v129_v12 = vunpack.c.h.bf16 %v139_v9  ;;  %v33_v13 = vunpack.c.l.bf16 %v23_v2  ;;  %v34_v14 = vunpack.c.l.bf16 %v24_v8  ;;  %v131_v15 = vld [vmem:[%s224_s2] sm:$0xff]   ;;  %v140_v16 = vld [vmem:[%s224_s2 + $0x8] sm:$0xff]   ;;  %v43_v17 = vld [vmem:[%s224_s2 + $0x10] sm:$0x7] }
   0x4   :  { %v37_v18 = vunpack.c.h.bf16 %v24_v8  ;;  %v38_v19 = vunpack.c.l.bf16 %v28_v10  ;;  %v132_v20 = vunpack.c.l.bf16 %v131_v15  ;;  %v133_v21 = vunpack.c.h.bf16 %v131_v15 }
   0x5   :  { %9 = vsyncpa [#allocation6], 0  ;;  %v136_v22 = vunpack.c.l.bf16 %v140_v16  ;;  %v137_v23 = vunpack.c.h.bf16 %v140_v16  ;;  %v48_v24 = vunpack.c.l.bf16 %v43_v17  ;;  %vm63_vm0 = vcmask 1044480   ;;  %s166_s30 = smov [#allocation5]  }
   0x6   :  { %v49_v25 = vmul.f32 %v132_v20, %v120_v4  ;;  %v50_v26 = vmul.f32 %v133_v21, %v121_v5  ;;  %v54_v27 = vmul.f32 %v132_v20, %v34_v14  ;;  %v55_v28 = vmul.f32 %v133_v21, %v128_v11  ;;  %s110_s4 = sshll.u32 %s166_s30, 4  ;;  %s111_s4 = int_to_ptr.vmem [resolvable:$true] %s110_s4 }
   0x7   :  { %v51_v29 = vmul.f32 %v136_v22, %v124_v6  ;;  %v52_v30 = vmul.f32 %v137_v23, %v125_v7  ;;  %v53_v31 = vmul.f32 %v48_v24, %v33_v13  ;;  %v56_v32 = vmul.f32 %v136_v22, %v129_v12  ;;  %s143_s5 = scalar_lea.vmem %s111_s4, 16  ;;  %s147_s6 = scalar_lea.vmem %s111_s4, 32 }
   0x8   :  { %v57_v33 = vmul.f32 %v137_v23, %v37_v18  ;;  %v58_v34 = vmul.f32 %v48_v24, %v38_v19  ;;  %v60_v35 = vadd.f32 %v50_v26, %v49_v25  ;;  %v72_v36 = vadd.f32 %v55_v28, %v54_v27  ;;  %v59_v55 = vld [vmem:[#allocation2] sm:$0x3]  ;;  %p144_p0 = scmp.ne.s32.totalorder %s111_s4, %s143_s5  ;;  %p148_p1 = scmp.lt.s32.totalorder %s111_s4, %s111_s4 }
   0x9   :  { %v64_v39 = vsel %vm63_vm0, %v53_v31, 0.0  ;;  %vm85_vm1 = vcmask 1041409   ;;  %vm94_vm2 = vcmask 1041408   ;;  %v99_v62 = vstv %s222_s0  ;;  %p149_p2 = scmp.lt.s32.totalorder %s147_s6, %s143_s5 }
   0xa   :  { %v61_v37 = vadd.f32 %v60_v35, %v51_v29  ;;  %v73_v38 = vadd.f32 %v72_v36, %v56_v32  ;;  %v75_v40 = vsel %vm63_vm0, %v58_v34, 0.0  ;;  %vm102_vm3 = vcmask 0  }
   0xb   :  { %p150_p3 = por %p149_p2, %p148_p1 }
   0xc   :  { %v62_v41 = vadd.f32 %v61_v37, %v52_v30  ;;  %v74_v42 = vadd.f32 %v73_v38, %v57_v33 }
   0xd   :  { %p151_p4 = pnand %p150_p3, %p144_p0 }
   0xe   :  { %v65_v43 = vadd.f32 %v64_v39, %v62_v41  ;;  %v76_v44 = vadd.f32 %v75_v40, %v74_v42 }
  0x10   :  { %v66_v45 = vrot.slane %v65_v43, 4  ;;  %v77_v46 = vrot.slane %v76_v44, 4 }
  0x12   :  { %v67_v47 = vadd.f32 %v66_v45, %v65_v43  ;;  %v78_v48 = vadd.f32 %v77_v46, %v76_v44 }
  0x14   :  { %v68_v49 = vrot.slane %v67_v47, 2  ;;  %v79_v50 = vrot.slane %v78_v48, 2 }
  0x16   :  { %v69_v51 = vadd.f32 %v68_v49, %v67_v47  ;;  %v80_v52 = vadd.f32 %v79_v50, %v78_v48 }
  0x18   :  { %v70_v53 = vrot.slane %v69_v51, 1  ;;  %v81_v54 = vrot.slane %v80_v52, 1 }
  0x1a   :  { %v71_v56 = vadd.f32 %v70_v53, %v69_v51  ;;  %v82_v57 = vadd.f32 %v81_v54, %v80_v52 }
  0x1c   :  { %v86_v58 = vsel %vm85_vm1, %v82_v57, %v71_v56 }
  0x1d   :  { %v88_v59 = vadd.f32 %v86_v58, %v59_v55 }
  0x1f   :  { %89 = vst [vmem:[#allocation2] sm:$0x3] %v88_v59 }
  0x26   :  { %v93_v60 = vld [vmem:[#allocation2] sm:$0x3] }
  0x27   :  { %v95_v61 = vsel %vm94_vm2, %v93_v60, 0.0 }
  0x28   :  { %96 = vadd.xlane.f32.xlu0 %v95_v61 }
  0xb1   :  { %v97_v63 = vpop.xlane.xlu0 %96 }
  0xb2   :  { %v100_v0 = vadd.f32 %v99_v62, %v97_v63 }
  0xb4   :  { %v101_v1 = vpack.c.bf16 %v100_v0, %v100_v0 }
  0xb6   :  { %103 = vst.msk [vmem:[#allocation5] sm:$0x1] %vm102_vm3, %v101_v1 }
  0xb7   :  { %154 = shalt.err (!%p151_p4)
}
  0xb8   :  { %113 = dma.vmem_to_hbm [thread:$0]  %s111_s4, 16, %s225_s3, [#allocation6]  }
  0xb9   :  { %163 = dma.done.wait [#allocation6], 16  }
  0xba   :  { %164 = vsyncadd [#allocation6], 4294967280 }
  0xbb   :  { %117 = vsyncpa [#allocation6], 1 }

</bundles_post_ra>
